<compile_context>
chip_gen: v5e
topology: v5e:2x2
jax: 0.10.0
libtpu: 0.0.40
codegen_flags: <defaults>
</compile_context>

<pallas_src>
import functools
import numpy as np
import jax
import jax.numpy as jnp
from jax.experimental import pallas as pl
from jax.experimental.pallas import tpu as pltpu


# ----------------------------------------------------------------------------
# Host-side (glue): build the dense resampling matrix, mirroring the PyTorch
# `cubic` / `contribute` functions exactly.
# ----------------------------------------------------------------------------
def _cubic(x):
    absx = np.abs(x)
    absx2 = absx * absx
    absx3 = absx2 * absx
    cond1 = (absx <= 1).astype(np.float32)
    cond2 = ((absx > 1) & (absx <= 2)).astype(np.float32)
    return (1.5 * absx3 - 2.5 * absx2 + 1) * cond1 + \
           (-0.5 * absx3 + 2.5 * absx2 - 4 * absx + 2) * cond2


def _resample_matrix(in_size, out_size, scale):
    """Dense (out_size, in_size) matrix equivalent to gather+weight+sum."""
    kernel_width = 4.0
    if scale < 1:
        kernel_width = 4.0 / scale
    x = np.arange(1, out_size + 1, dtype=np.float32)
    u = x / scale + 0.5 * (1 - 1 / scale)
    left = np.floor(u - kernel_width / 2)
    P = int(np.ceil(kernel_width) + 2)
    indice = left[:, None] + np.arange(P, dtype=np.float32)[None, :]
    mid = u[:, None] - indice
    if scale < 1:
        weight = scale * _cubic(mid * scale)
    else:
        weight = _cubic(mid)
    weight = weight / np.sum(weight, axis=1, keepdims=True)
    indice = np.minimum(np.maximum(1.0, indice), float(in_size))
    # prune taps that are zero in the first output row (matches reference)
    kill = (weight[0] == 0)
    weight = weight[:, ~kill]
    indice = indice[:, ~kill]
    # scatter-add into a dense matrix (clamped indices may repeat at borders)
    M = np.zeros((out_size, in_size), dtype=np.float32)
    idx = indice.astype(np.int64) - 1
    rows = np.broadcast_to(np.arange(out_size)[:, None], idx.shape)
    np.add.at(M, (rows, idx), weight.astype(np.float32))
    return M


# ----------------------------------------------------------------------------
# Pallas kernel: one batch-tile of TB images per grid step, two MXU GEMMs,
# no scratch, no regroup loop.
# ----------------------------------------------------------------------------
def _resize_kernel(x_ref, wh_ref, wwt_ref, o_ref, *, tb, h):
    # x_ref  : (TB*H, W)        TB stacked input images (f32 or bf16)
    # wh_ref : (OH, H)          H-resampling matrix (resident across steps)
    # wwt_ref: (W, OW)          W-resampling matrix, transposed (resident)
    # o_ref  : (1, TB, OH, OW)  output tile (f32)
    oh = wh_ref.shape[0]
    # GEMM 1 (MXU): resample along W for all TB images at once, M = TB*H.
    t = jnp.dot(x_ref[...], wwt_ref[...],
                preferred_element_type=jnp.float32)            # (TB*H, OW) f32
    ow = t.shape[-1]

    if tb == 1:
        out = jnp.dot(wh_ref[...], t.astype(wh_ref.dtype),
                      preferred_element_type=jnp.float32)      # (OH, OW)
        o_ref[0, 0] = out.astype(o_ref.dtype)
    elif h % 8 == 0:
        # GEMM 2 (MXU, batched over TB): resample along H.  The reshape only
        # splits whole sublane tiles (H % 8 == 0), so it is layout-preserving,
        # and the batched dot_general writes a (TB, OH, OW) block directly —
        # no VMEM scratch, no unrolled masked stores, no host transpose.
        t3 = t.reshape(tb, h, ow).astype(wh_ref.dtype)
        wh_b = jnp.broadcast_to(wh_ref[...], (tb, oh, h))
        out = jax.lax.dot_general(
            wh_b, t3,
            dimension_numbers=(((2,), (1,)), ((0,), (0,))),
            preferred_element_type=jnp.float32)                # (TB, OH, OW)
        o_ref[0] = out.astype(o_ref.dtype)
    else:
        # Rare fallback (H not a multiple of the sublane tile, TB > 1):
        # per-image 2-D GEMM2 writing straight into the output block.
        for j in range(tb):
            tj = t[j * h:(j + 1) * h, :].astype(wh_ref.dtype)
            o_ref[0, j] = jnp.dot(wh_ref[...], tj,
                                  preferred_element_type=jnp.float32
                                  ).astype(o_ref.dtype)


# ----------------------------------------------------------------------------
# Wrapper: generation-aware tiling heuristics + pallas_call + layout plumbing.
# ----------------------------------------------------------------------------
def _vmem_bytes(tb, h, w, oh, ow, in_itemsize, weight_bufs=1):
    x_blk = 2 * tb * h * w * in_itemsize            # double-buffered input block
    o_blk = 2 * tb * oh * ow * 4                    # double-buffered output (f32)
    wgt = weight_bufs * (oh * h + w * ow) * in_itemsize   # resident weights
    t_val = tb * h * ow * 4                         # GEMM1 result (f32 value)
    whb = tb * oh * h * in_itemsize                 # broadcast Wh for GEMM2
    return x_blk + o_blk + wgt + t_val + whb


def _tpu_vmem_plan():
    """Returns (budget for tile picking, cap on vmem_limit_bytes, prefer >=2 steps)."""
    cap = 128 * 2**20
    try:
        cap = int(pltpu.get_tpu_info().vmem_capacity_bytes)
    except Exception:
        pass
    if cap <= 80 * 2**20:
        # v7x-class: 64 MiB per TensorCore, 2 cores.  Keep compiler headroom
        # and leave >=2 grid steps so the "parallel" batch axis load-balances
        # across the two TensorCores.
        return 36 * 2**20, 48 * 2**20, True
    # v5e / v6e: 128 MiB VMEM, single TensorCore -> use most of it; an extra
    # grid step buys nothing on a single core.
    return int(0.72 * cap), int(min(cap - 24 * 2**20, 100 * 2**20)), False


def _pick_tile_batch(bc, h, w, oh, ow, in_itemsize, sublane, budget_bytes,
                     prefer_multi_step, max_tb=256):
    """Images per grid step: largest layout-legal divisor of bc within budget."""
    divisors = [d for d in range(1, bc + 1) if bc % d == 0 and d <= max_tb]
    if not divisors:
        divisors = [1]

    def aligned(d):
        # (sublane, 128) rule on the x block: whole-array block, or a sublane
        # tile multiple (16 rows for bf16, 8 for f32).  Lane dim is full (=W).
        return d == bc or (d * h) % sublane == 0

    def fits(d):
        return _vmem_bytes(d, h, w, oh, ow, in_itemsize) <= budget_bytes

    good = [d for d in divisors if aligned(d) and fits(d)]
    if good:
        if prefer_multi_step and bc > 1:
            even_multi = [d for d in good if (bc // d) >= 2 and (bc // d) % 2 == 0]
            if even_multi:
                return max(even_multi)
            multi = [d for d in good if (bc // d) >= 2]
            if multi:
                return max(multi)
        return max(good)
    # Every aligned divisor is over budget: take the smallest aligned one and
    # let vmem_limit_bytes stretch (band tiling is the real fix, see TODO).
    aligned_divs = [d for d in divisors if aligned(d)]
    if aligned_divs:
        return min(aligned_divs)
    # No aligned partial tile exists: a whole-array block is always legal.
    return bc


def _build_call(nsteps, tb, h, w, oh, ow, out_dtype, vmem_limit, cost,
                single_buffer_weights):
    weight_kwargs = {}
    if single_buffer_weights:
        # Constant-index weights only need one VMEM buffer (default is 2).
        weight_kwargs = dict(pipeline_mode=pl.Buffered(1))
    kernel = functools.partial(_resize_kernel, tb=tb, h=h)
    return pl.pallas_call(
        kernel,
        out_shape=jax.ShapeDtypeStruct((nsteps, tb, oh, ow), out_dtype),
        grid=(nsteps,),
        in_specs=[
            pl.BlockSpec((tb * h, w), lambda i: (i, 0)),        # TB stacked images
            pl.BlockSpec((oh, h), lambda i: (0, 0), **weight_kwargs),   # Wh
            pl.BlockSpec((w, ow), lambda i: (0, 0), **weight_kwargs),   # Ww^T
        ],
        out_specs=pl.BlockSpec((1, tb, oh, ow), lambda i: (i, 0, 0, 0)),
        compiler_params=pltpu.CompilerParams(
            dimension_semantics=("parallel",),
            vmem_limit_bytes=int(vmem_limit)),
        cost_estimate=cost,
    )


def bicubic_imresize(x, scale=1 / 4, use_bf16=False):
    """x: (B, C, H, W) float32 -> (B, C, int(H*scale), int(W*scale)) float32.

    use_bf16=True (recommended for throughput) casts the input and both
    resampling matrices to bfloat16 with f32 MXU accumulation; it halves the
    dominant HBM read stream at the cost of ~1e-2 absolute error.
    """
    b, c, h, w = x.shape
    oh, ow = int(h * scale), int(w * scale)
    bc = b * c
    out_dtype = x.dtype

    wh = jnp.asarray(_resample_matrix(h, oh, scale))          # (OH, H)
    wwt = jnp.asarray(_resample_matrix(w, ow, scale).T)       # (W, OW)

    x2 = x.reshape(bc * h, w)                                 # free reshape (NCHW)
    if use_bf16:
        x2 = x2.astype(jnp.bfloat16)
        wh = wh.astype(jnp.bfloat16)
        wwt = wwt.astype(jnp.bfloat16)
    in_itemsize = int(x2.dtype.itemsize)
    sublane = 16 if in_itemsize == 2 else 8

    budget, limit_cap, prefer_multi_step = _tpu_vmem_plan()
    tb = _pick_tile_batch(bc, h, w, oh, ow, in_itemsize, sublane, budget,
                          prefer_multi_step)
    nsteps = bc // tb

    est = _vmem_bytes(tb, h, w, oh, ow, in_itemsize)
    vmem_limit = min(max(2 * est, 16 * 2**20), limit_cap)
    vmem_limit = max(vmem_limit, est + 4 * 2**20)             # over-budget fallback

    flops = int(2 * bc * (h * w * ow + oh * h * ow))
    bytes_accessed = int(in_itemsize * (bc * h * w + oh * h + w * ow)
                         + 4 * bc * oh * ow)
    cost = pl.CostEstimate(flops=flops, transcendentals=0,
                           bytes_accessed=bytes_accessed)

    try:
        out4 = _build_call(nsteps, tb, h, w, oh, ow, out_dtype, vmem_limit,
                           cost, single_buffer_weights=True)(x2, wh, wwt)
    except Exception:
        # pl.Buffered(1) rejected by this jax version: fall back to default
        # (double-buffered) weight specs.
        out4 = _build_call(nsteps, tb, h, w, oh, ow, out_dtype, vmem_limit,
                           cost, single_buffer_weights=False)(x2, wh, wwt)

    # (nsteps, TB, OH, OW) -> (B, C, OH, OW): pure reshape, no transpose.
    return out4.reshape(b, c, oh, ow)


# ----------------------------------------------------------------------------
# Pure-numpy reference (direct transcription of the PyTorch forward) for check.
# ----------------------------------------------------------------------------
def _reference(x_np, scale=1 / 4):
    b, c, h, w = x_np.shape
    Mh = _resample_matrix(h, int(h * scale), scale)
    Mw = _resample_matrix(w, int(w * scale), scale)
    return np.einsum('oh,bchw,pw->bcop', Mh, x_np, Mw).astype(np.float32)


if __name__ == "__main__":
    key = jax.random.PRNGKey(0)
    x = jax.random.normal(key, (2, 4, 16, 16), dtype=jnp.float32)

    ref = _reference(np.asarray(x), scale=1 / 4)

    # f32 path: exact module semantics, tight tolerance.
    out = jax.block_until_ready(bicubic_imresize(x, scale=1 / 4))
    assert out.shape == (2, 4, 4, 4), out.shape
    np.testing.assert_allclose(np.asarray(out), ref, atol=1e-4, rtol=1e-4)

    # bf16 throughput path: same kernel, reduced-precision operands,
    # f32 accumulation -> looser tolerance.
    out_bf16 = jax.block_until_ready(bicubic_imresize(x, scale=1 / 4,
                                                      use_bf16=True))
    assert out_bf16.shape == (2, 4, 4, 4), out_bf16.shape
    np.testing.assert_allclose(np.asarray(out_bf16), ref, atol=6e-2, rtol=6e-2)

    print("KERNEL_OK")
</pallas_src>

<mosaic_0001>
module attributes {stable_mosaic.version = 11 : i64} {
  func.func @_resize_kernel(%arg0: i32, %arg1: memref<128x16xf32, #tpu.memory_space<vmem>>, %arg2: memref<4x16xf32, #tpu.memory_space<vmem>>, %arg3: memref<16x4xf32, #tpu.memory_space<vmem>>, %arg4: memref<1x8x4x4xf32, #tpu.memory_space<vmem>>) attributes {dimension_semantics = [#tpu.dimension_semantics<parallel>], iteration_bounds = array<i64: 1>, scalar_prefetch = 0 : i64, scratch_operands = 0 : i64, tpu.core_type = #tpu.core_type<tc>, window_params = [{transform_indices = @transform_0, window_bounds = array<i64: 128, 16>}, {pipeline_mode = #tpu.pipeline_mode<synchronous>, transform_indices = @transform_1, window_bounds = array<i64: 4, 16>}, {pipeline_mode = #tpu.pipeline_mode<synchronous>, transform_indices = @transform_2, window_bounds = array<i64: 16, 4>}, {transform_indices = @transform_3, window_bounds = array<i64: 1, 8, 4, 4>}]} {
    %c0 = arith.constant 0 : index
    %c0_0 = arith.constant 0 : index
    %0 = vector.load %arg1[%c0, %c0_0] : memref<128x16xf32, #tpu.memory_space<vmem>>, vector<128x16xf32>
    %c0_1 = arith.constant 0 : index
    %c0_2 = arith.constant 0 : index
    %1 = vector.load %arg3[%c0_1, %c0_2] : memref<16x4xf32, #tpu.memory_space<vmem>>, vector<16x4xf32>
    %cst = arith.constant dense<0.000000e+00> : vector<128x4xf32>
    %2 = tpu.matmul %0, %1, %cst {dimension_numbers = #tpu.dot_dimension_numbers<[1], [0], [0], [1], [0, 0, 1, 1], [], []>} : vector<128x16xf32>, vector<16x4xf32>, vector<128x4xf32> -> vector<128x4xf32>
    %3 = vector.shape_cast %2 : vector<128x4xf32> to vector<8x16x4xf32>
    %c0_3 = arith.constant 0 : index
    %c0_4 = arith.constant 0 : index
    %4 = vector.load %arg2[%c0_3, %c0_4] : memref<4x16xf32, #tpu.memory_space<vmem>>, vector<4x16xf32>
    %5 = vector.shape_cast %4 : vector<4x16xf32> to vector<1x4x16xf32>
    %6 = vector.broadcast %5 : vector<1x4x16xf32> to vector<8x4x16xf32>
    %cst_5 = arith.constant dense<0.000000e+00> : vector<8x4x4xf32>
    %7 = tpu.matmul %6, %3, %cst_5 {dimension_numbers = #tpu.dot_dimension_numbers<[2], [1], [1], [2], [0, 0, 0, 1, 1, 2], [0], [0]>} : vector<8x4x16xf32>, vector<8x16x4xf32>, vector<8x4x4xf32> -> vector<8x4x4xf32>
    %c0_6 = arith.constant 0 : index
    %c0_7 = arith.constant 0 : index
    %c0_8 = arith.constant 0 : index
    %c0_9 = arith.constant 0 : index
    %8 = vector.load %arg4[%c0_6, %c0_7, %c0_8, %c0_9] : memref<1x8x4x4xf32, #tpu.memory_space<vmem>>, vector<1x8x4x4xf32>
    %9 = vector.shape_cast %8 : vector<1x8x4x4xf32> to vector<8x4x4xf32>
    %10 = vector.shape_cast %7 : vector<8x4x4xf32> to vector<1x8x4x4xf32>
    tpu.vector_store %arg4[%c0_6, %c0_7, %c0_8, %c0_9], %10 {strides = array<i32>} : memref<1x8x4x4xf32, #tpu.memory_space<vmem>>, vector<1x8x4x4xf32>,
    return
  }
  func.func @transform_0(%arg0: i32) -> (i32, i32) {
    %c0_i32 = arith.constant 0 : i32
    %c0_i32_0 = arith.constant 0 : i32
    return %arg0, %c0_i32 : i32, i32
  }
  func.func @transform_1(%arg0: i32) -> (i32, i32) {
    %c0_i32 = arith.constant 0 : i32
    %c0_i32_0 = arith.constant 0 : i32
    %c0_i32_1 = arith.constant 0 : i32
    return %c0_i32, %c0_i32_0 : i32, i32
  }
  func.func @transform_2(%arg0: i32) -> (i32, i32) {
    %c0_i32 = arith.constant 0 : i32
    %c0_i32_0 = arith.constant 0 : i32
    %c0_i32_1 = arith.constant 0 : i32
    return %c0_i32, %c0_i32_0 : i32, i32
  }
  func.func @transform_3(%arg0: i32) -> (i32, i32, i32, i32) {
    %c0_i32 = arith.constant 0 : i32
    %c0_i32_0 = arith.constant 0 : i32
    %c0_i32_1 = arith.constant 0 : i32
    %c0_i32_2 = arith.constant 0 : i32
    return %arg0, %c0_i32, %c0_i32_0, %c0_i32_1 : i32, i32, i32, i32
  }
}

module attributes {stable_mosaic.version = 11 : i64} {
  func.func @_resize_kernel(%arg0: i32, %arg1: memref<128x16xf32, #tpu.memory_space<vmem>>, %arg2: memref<4x16xf32, #tpu.memory_space<vmem>>, %arg3: memref<16x4xf32, #tpu.memory_space<vmem>>, %arg4: memref<1x8x4x4xf32, #tpu.memory_space<vmem>>) attributes {dimension_semantics = [#tpu.dimension_semantics<parallel>], iteration_bounds = array<i64: 1>, scalar_prefetch = 0 : i64, scratch_operands = 0 : i64, tpu.core_type = #tpu.core_type<tc>, window_params = [{transform_indices = @transform_0, window_bounds = array<i64: 128, 16>}, {pipeline_mode = #tpu.pipeline_mode<synchronous>, transform_indices = @transform_1, window_bounds = array<i64: 4, 16>}, {pipeline_mode = #tpu.pipeline_mode<synchronous>, transform_indices = @transform_2, window_bounds = array<i64: 16, 4>}, {transform_indices = @transform_3, window_bounds = array<i64: 1, 8, 4, 4>}]} {
    %c0 = arith.constant 0 : index
    %c0_0 = arith.constant 0 : index
    %0 = vector.load %arg1[%c0, %c0_0] : memref<128x16xf32, #tpu.memory_space<vmem>>, vector<128x16xf32>
    %c0_1 = arith.constant 0 : index
    %c0_2 = arith.constant 0 : index
    %1 = vector.load %arg3[%c0_1, %c0_2] : memref<16x4xf32, #tpu.memory_space<vmem>>, vector<16x4xf32>
    %cst = arith.constant dense<0.000000e+00> : vector<128x4xf32>
    %2 = tpu.matmul %0, %1, %cst {dimension_numbers = #tpu.dot_dimension_numbers<[1], [0], [0], [1], [0, 0, 1, 1], [], []>} : vector<128x16xf32>, vector<16x4xf32>, vector<128x4xf32> -> vector<128x4xf32>
    %3 = vector.shape_cast %2 : vector<128x4xf32> to vector<8x16x4xf32>
    %c0_3 = arith.constant 0 : index
    %c0_4 = arith.constant 0 : index
    %4 = vector.load %arg2[%c0_3, %c0_4] : memref<4x16xf32, #tpu.memory_space<vmem>>, vector<4x16xf32>
    %5 = vector.shape_cast %4 : vector<4x16xf32> to vector<1x4x16xf32>
    %6 = vector.broadcast %5 : vector<1x4x16xf32> to vector<8x4x16xf32>
    %cst_5 = arith.constant dense<0.000000e+00> : vector<8x4x4xf32>
    %7 = tpu.matmul %6, %3, %cst_5 {dimension_numbers = #tpu.dot_dimension_numbers<[2], [1], [1], [2], [0, 0, 0, 1, 1, 2], [0], [0]>} : vector<8x4x16xf32>, vector<8x16x4xf32>, vector<8x4x4xf32> -> vector<8x4x4xf32>
    %c0_6 = arith.constant 0 : index
    %c0_7 = arith.constant 0 : index
    %c0_8 = arith.constant 0 : index
    %c0_9 = arith.constant 0 : index
    %8 = vector.load %arg4[%c0_6, %c0_7, %c0_8, %c0_9] : memref<1x8x4x4xf32, #tpu.memory_space<vmem>>, vector<1x8x4x4xf32>
    %9 = vector.shape_cast %8 : vector<1x8x4x4xf32> to vector<8x4x4xf32>
    %10 = vector.shape_cast %7 : vector<8x4x4xf32> to vector<1x8x4x4xf32>
    tpu.vector_store %arg4[%c0_6, %c0_7, %c0_8, %c0_9], %10 {strides = array<i32>} : memref<1x8x4x4xf32, #tpu.memory_space<vmem>>, vector<1x8x4x4xf32>,
    return
  }
  func.func @transform_0(%arg0: i32) -> (i32, i32) {
    %c0_i32 = arith.constant 0 : i32
    %c0_i32_0 = arith.constant 0 : i32
    return %arg0, %c0_i32 : i32, i32
  }
  func.func @transform_1(%arg0: i32) -> (i32, i32) {
    %c0_i32 = arith.constant 0 : i32
    %c0_i32_0 = arith.constant 0 : i32
    %c0_i32_1 = arith.constant 0 : i32
    return %c0_i32, %c0_i32_0 : i32, i32
  }
  func.func @transform_2(%arg0: i32) -> (i32, i32) {
    %c0_i32 = arith.constant 0 : i32
    %c0_i32_0 = arith.constant 0 : i32
    %c0_i32_1 = arith.constant 0 : i32
    return %c0_i32, %c0_i32_0 : i32, i32
  }
  func.func @transform_3(%arg0: i32) -> (i32, i32, i32, i32) {
    %c0_i32 = arith.constant 0 : i32
    %c0_i32_0 = arith.constant 0 : i32
    %c0_i32_1 = arith.constant 0 : i32
    %c0_i32_2 = arith.constant 0 : i32
    return %arg0, %c0_i32, %c0_i32_0, %c0_i32_1 : i32, i32, i32, i32
  }
}

</mosaic_0001>

<bundles_post_ra>
// kernel: tpu_custom_call.1
= control target key start
LH: loop header
LB: loop body
LE: loop exit
PB: predicated region body
PF: predicated region fallthrough
CT: control target
= control target key end

     0   :  { %vm32_vm0 = vcmask 130048   ;;  %vm310_vm1 = vcmask 27648   ;;  %s486_s2 = inlined_call_operand.vmem [shape: f32[16,4], index: 2, kind: input, shape index: {}]   ;;  %s487_s0 = inlined_call_operand.vmem [shape: f32[128,16], index: 0, kind: input, shape index: {}]   ;;  %s488_s1 = inlined_call_operand.vmem [shape: f32[4,16], index: 1, kind: input, shape index: {}]   ;;  %s489_s3 = inlined_call_operand.vmem [shape: f32[1,8,4,4], index: 3, kind: output, shape index: {}]  }
   0x1   :  { %v31_v0 = vld [vmem:[%s486_s2 + $0x8] sm:$0xff]  ;;  %v30_v1 = vld [vmem:[%s486_s2] sm:$0xff]  ;;  %v20_v4 = vld [vmem:[%s487_s0 + $0x30] sm:$0xff] }
   0x2   :  { %95 = vmatpush.msra.mxu0 %v31_v0  ;;  %v14_v2 = vld [vmem:[%s487_s0] sm:$0xff]  ;;  %349 = vmatpush.msra.mxu3 %v31_v0  ;;  %v23_v5 = vld [vmem:[%s487_s0 + $0x48] sm:$0xff]  ;;  %v21_v8 = vld [vmem:[%s487_s0 + $0x38] sm:$0xff] }
   0x3   :  { %347 = vmatpush.msra.mxu1 %v31_v0  ;;  %v26_v3 = vld [vmem:[%s487_s0 + $0x60] sm:$0xff]  ;;  %348 = vmatpush.msra.mxu2 %v31_v0  ;;  %v15_v6 = vld [vmem:[%s487_s0 + $0x8] sm:$0xff]  ;;  %v24_v9 = vld [vmem:[%s487_s0 + $0x50] sm:$0xff] }
   0x4   :  { %96 = vmatpush.msra.mxu0 %v30_v1  ;;  %352 = vmatpush.msra.mxu3 %v30_v1  ;;  %v27_v7 = vld [vmem:[%s487_s0 + $0x68] sm:$0xff]  ;;  %v16_v10 = vld [vmem:[%s487_s0 + $0x10] sm:$0xff]  ;;  %v25_v12 = vld [vmem:[%s487_s0 + $0x58] sm:$0xff] }
   0x5   :  { %323 = vmatmul.msk.f32.vlgmr.msra.gmra.mxu0 %vm32_vm0, %v14_v2  ;;  %335 = vmatmul.msk.f32.vlgmr.msra.gmra.mxu3 %vm32_vm0, %v26_v3  ;;  %v28_v11 = vld [vmem:[%s487_s0 + $0x70] sm:$0xff]  ;;  %v22_v13 = vld [vmem:[%s487_s0 + $0x40] sm:$0xff]  ;;  %v17_v14 = vld [vmem:[%s487_s0 + $0x18] sm:$0xff] }
   0x6   :  { %350 = vmatpush.msra.mxu1 %v30_v1  ;;  %351 = vmatpush.msra.mxu2 %v30_v1  ;;  %v29_v15 = vld [vmem:[%s487_s0 + $0x78] sm:$0xff]  ;;  %v18_v16 = vld [vmem:[%s487_s0 + $0x20] sm:$0xff]  ;;  %v19_v17 = vld [vmem:[%s487_s0 + $0x28] sm:$0xff] }
   0x7   :  { %329 = vmatmul.msk.f32.vlgmr.msra.gmra.mxu1 %vm32_vm0, %v20_v4  ;;  %332 = vmatmul.msk.f32.vlgmr.msra.gmra.mxu2 %vm32_vm0, %v23_v5  ;;  %v146_v23 = vld [vmem:[%s488_s1] sm:$0xf] }
   0xd   :  { %324 = vmatmul.msk.f32.gmra.mxu0 %vm32_vm0, %v15_v6  ;;  %336 = vmatmul.msk.f32.gmra.mxu3 %vm32_vm0, %v27_v7 }
   0xf   :  { %330 = vmatmul.msk.f32.gmra.mxu1 %vm32_vm0, %v21_v8  ;;  %333 = vmatmul.msk.f32.gmra.mxu2 %vm32_vm0, %v24_v9 }
  0x15   :  { %325 = vmatmul.msk.f32.gmra.mxu0 %vm32_vm0, %v16_v10  ;;  %337 = vmatmul.msk.f32.gmra.mxu3 %vm32_vm0, %v28_v11 }
  0x17   :  { %334 = vmatmul.msk.f32.gmra.mxu2 %vm32_vm0, %v25_v12  ;;  %331 = vmatmul.msk.f32.gmra.mxu1 %vm32_vm0, %v22_v13 }
  0x1d   :  { %326 = vmatmul.msk.f32.gmra.mxu0 %vm32_vm0, %v17_v14  ;;  %338 = vmatmul.msk.f32.gmra.mxu3 %vm32_vm0, %v29_v15 }
  0x25   :  { %327 = vmatmul.msk.f32.gmra.mxu0 %vm32_vm0, %v18_v16 }
  0x2d   :  { %328 = vmatmul.msk.f32.gmra.mxu0 %vm32_vm0, %v19_v17 }
  0x82   :  { %v98_v18 = vpop.f32.mrf.mxu0 }
  0x84   :  { %v116_v19 = vpop.f32.mrf.mxu1 }
  0x88   :  { %v134_v20 = vpop.f32.mrf.mxu3 }
  0x8a   :  { %v101_v21 = vpop.f32.mrf.mxu0  ;;  %v125_v26 = vpop.f32.mrf.mxu2 }
  0x8b   :  { %164 = vmatpush.msrb.mxu1 %v101_v21 }
  0x8c   :  { %v119_v22 = vpop.f32.mrf.mxu1 }
  0x8d   :  { %165 = vmatpush.msrb.mxu1 %v98_v18 }
  0x8e   :  { %339 = vmatmul.msk.f32.vlgmr.msrb.gmra.mxu1 %vm32_vm0, %v146_v23 }
  0x8f   :  { %224 = vmatpush.msra.mxu1 %v119_v22 }
  0x90   :  { %v137_v24 = vpop.f32.mrf.mxu3 }
  0x91   :  { %225 = vmatpush.msra.mxu1 %v116_v19 }
  0x92   :  { %v104_v25 = vpop.f32.mrf.mxu0  ;;  %v128_v31 = vpop.f32.mrf.mxu2 }
  0x93   :  { %284 = vmatpush.msrb.mxu1 %v137_v24 }
  0x94   :  { %v122_v29 = vpop.f32.mrf.mxu1 }
  0x95   :  { %285 = vmatpush.msrb.mxu1 %v134_v20 }
  0x96   :  { %342 = vmatmul.msk.f32.vlgmr.msra.gmra.mxu1 %vm32_vm0, %v146_v23 }
  0x98   :  { %v140_v27 = vpop.f32.mrf.mxu3 }
  0x9a   :  { %v107_v28 = vpop.f32.mrf.mxu0  ;;  %v131_v34 = vpop.f32.mrf.mxu2 }
  0x9b   :  { %184 = vmatpush.msrb.mxu2 %v107_v28 }
  0x9d   :  { %185 = vmatpush.msrb.mxu2 %v104_v25 }
  0x9e   :  { %340 = vmatmul.msk.f32.vlgmr.msrb.gmra.mxu2 %vm32_vm0, %v146_v23  ;;  %345 = vmatmul.msk.f32.vlgmr.msrb.gmra.mxu1 %vm32_vm0, %v146_v23 }
  0x9f   :  { %244 = vmatpush.msra.mxu2 %v125_v26 }
  0xa0   :  { %v143_v30 = vpop.f32.mrf.mxu3 }
  0xa1   :  { %245 = vmatpush.msra.mxu2 %v122_v29 }
  0xa2   :  { %v110_v32 = vpop.f32.mrf.mxu0 }
  0xa3   :  { %304 = vmatpush.msrb.mxu2 %v143_v30 }
  0xa5   :  { %305 = vmatpush.msrb.mxu2 %v140_v27 }
  0xa6   :  { %343 = vmatmul.msk.f32.vlgmr.msra.gmra.mxu2 %vm32_vm0, %v146_v23 }
  0xaa   :  { %v113_v33 = vpop.f32.mrf.mxu0 }
  0xab   :  { %204 = vmatpush.msrb.mxu3 %v113_v33 }
  0xad   :  { %205 = vmatpush.msrb.mxu3 %v110_v32 }
  0xae   :  { %341 = vmatmul.msk.f32.vlgmr.msrb.gmra.mxu3 %vm32_vm0, %v146_v23  ;;  %346 = vmatmul.msk.f32.vlgmr.msrb.gmra.mxu2 %vm32_vm0, %v146_v23 }
  0xaf   :  { %264 = vmatpush.msra.mxu3 %v131_v34 }
  0xb1   :  { %265 = vmatpush.msra.mxu3 %v128_v31 }
  0xb6   :  { %344 = vmatmul.msk.f32.vlgmr.msra.gmra.mxu3 %vm32_vm0, %v146_v23 }
 0x10b   :  { %v167_v35 = vpop.f32.mrf.mxu1 }
 0x10c   :  { %311 = vst.msk [vmem:[%s489_s3] sm:$0xf] %vm310_vm1, %v167_v35 }
 0x113   :  { %v227_v36 = vpop.f32.mrf.mxu1 }
 0x114   :  { %314 = vst.msk [vmem:[%s489_s3 + $0xc] sm:$0xf] %vm310_vm1, %v227_v36 }
 0x11b   :  { %v287_v37 = vpop.f32.mrf.mxu1 }
 0x11c   :  { %317 = vst.msk [vmem:[%s489_s3 + $0x18] sm:$0xf] %vm310_vm1, %v287_v37 }
 0x121   :  { %v187_v38 = vpop.f32.mrf.mxu2 }
 0x122   :  { %312 = vst.msk [vmem:[%s489_s3 + $0x4] sm:$0xf] %vm310_vm1, %v187_v38 }
 0x129   :  { %v247_v39 = vpop.f32.mrf.mxu2 }
 0x12a   :  { %315 = vst.msk [vmem:[%s489_s3 + $0x10] sm:$0xf] %vm310_vm1, %v247_v39 }
 0x131   :  { %v207_v40 = vpop.f32.mrf.mxu3  ;;  %v307_v41 = vpop.f32.mrf.mxu2 }
 0x132   :  { %313 = vst.msk [vmem:[%s489_s3 + $0x8] sm:$0xf] %vm310_vm1, %v207_v40 }
 0x133   :  { %318 = vst.msk [vmem:[%s489_s3 + $0x1c] sm:$0xf] %vm310_vm1, %v307_v41 }
 0x139   :  { %v267_v42 = vpop.f32.mrf.mxu3 }
 0x13a   :  { %316 = vst.msk [vmem:[%s489_s3 + $0x14] sm:$0xf] %vm310_vm1, %v267_v42 }

// kernel: tpu_custom_call.1
= control target key start
LH: loop header
LB: loop body
LE: loop exit
PB: predicated region body
PF: predicated region fallthrough
CT: control target
= control target key end

     0   :  { %vm32_vm0 = vcmask 130048   ;;  %vm310_vm1 = vcmask 27648   ;;  %s486_s2 = inlined_call_operand.vmem [shape: f32[16,4], index: 2, kind: input, shape index: {}]   ;;  %s487_s0 = inlined_call_operand.vmem [shape: f32[128,16], index: 0, kind: input, shape index: {}]   ;;  %s488_s1 = inlined_call_operand.vmem [shape: f32[4,16], index: 1, kind: input, shape index: {}]   ;;  %s489_s3 = inlined_call_operand.vmem [shape: f32[1,8,4,4], index: 3, kind: output, shape index: {}]  }
   0x1   :  { %v31_v0 = vld [vmem:[%s486_s2 + $0x8] sm:$0xff]  ;;  %v30_v1 = vld [vmem:[%s486_s2] sm:$0xff]  ;;  %v20_v4 = vld [vmem:[%s487_s0 + $0x30] sm:$0xff] }
   0x2   :  { %95 = vmatpush.msra.mxu0 %v31_v0  ;;  %v14_v2 = vld [vmem:[%s487_s0] sm:$0xff]  ;;  %349 = vmatpush.msra.mxu3 %v31_v0  ;;  %v23_v5 = vld [vmem:[%s487_s0 + $0x48] sm:$0xff]  ;;  %v21_v8 = vld [vmem:[%s487_s0 + $0x38] sm:$0xff] }
   0x3   :  { %347 = vmatpush.msra.mxu1 %v31_v0  ;;  %v26_v3 = vld [vmem:[%s487_s0 + $0x60] sm:$0xff]  ;;  %348 = vmatpush.msra.mxu2 %v31_v0  ;;  %v15_v6 = vld [vmem:[%s487_s0 + $0x8] sm:$0xff]  ;;  %v24_v9 = vld [vmem:[%s487_s0 + $0x50] sm:$0xff] }
   0x4   :  { %96 = vmatpush.msra.mxu0 %v30_v1  ;;  %352 = vmatpush.msra.mxu3 %v30_v1  ;;  %v27_v7 = vld [vmem:[%s487_s0 + $0x68] sm:$0xff]  ;;  %v16_v10 = vld [vmem:[%s487_s0 + $0x10] sm:$0xff]  ;;  %v25_v12 = vld [vmem:[%s487_s0 + $0x58] sm:$0xff] }
   0x5   :  { %323 = vmatmul.msk.f32.vlgmr.msra.gmra.mxu0 %vm32_vm0, %v14_v2  ;;  %335 = vmatmul.msk.f32.vlgmr.msra.gmra.mxu3 %vm32_vm0, %v26_v3  ;;  %v28_v11 = vld [vmem:[%s487_s0 + $0x70] sm:$0xff]  ;;  %v22_v13 = vld [vmem:[%s487_s0 + $0x40] sm:$0xff]  ;;  %v17_v14 = vld [vmem:[%s487_s0 + $0x18] sm:$0xff] }
   0x6   :  { %350 = vmatpush.msra.mxu1 %v30_v1  ;;  %351 = vmatpush.msra.mxu2 %v30_v1  ;;  %v29_v15 = vld [vmem:[%s487_s0 + $0x78] sm:$0xff]  ;;  %v18_v16 = vld [vmem:[%s487_s0 + $0x20] sm:$0xff]  ;;  %v19_v17 = vld [vmem:[%s487_s0 + $0x28] sm:$0xff] }
   0x7   :  { %329 = vmatmul.msk.f32.vlgmr.msra.gmra.mxu1 %vm32_vm0, %v20_v4  ;;  %332 = vmatmul.msk.f32.vlgmr.msra.gmra.mxu2 %vm32_vm0, %v23_v5  ;;  %v146_v23 = vld [vmem:[%s488_s1] sm:$0xf] }
   0xd   :  { %324 = vmatmul.msk.f32.gmra.mxu0 %vm32_vm0, %v15_v6  ;;  %336 = vmatmul.msk.f32.gmra.mxu3 %vm32_vm0, %v27_v7 }
   0xf   :  { %330 = vmatmul.msk.f32.gmra.mxu1 %vm32_vm0, %v21_v8  ;;  %333 = vmatmul.msk.f32.gmra.mxu2 %vm32_vm0, %v24_v9 }
  0x15   :  { %325 = vmatmul.msk.f32.gmra.mxu0 %vm32_vm0, %v16_v10  ;;  %337 = vmatmul.msk.f32.gmra.mxu3 %vm32_vm0, %v28_v11 }
  0x17   :  { %334 = vmatmul.msk.f32.gmra.mxu2 %vm32_vm0, %v25_v12  ;;  %331 = vmatmul.msk.f32.gmra.mxu1 %vm32_vm0, %v22_v13 }
  0x1d   :  { %326 = vmatmul.msk.f32.gmra.mxu0 %vm32_vm0, %v17_v14  ;;  %338 = vmatmul.msk.f32.gmra.mxu3 %vm32_vm0, %v29_v15 }
  0x25   :  { %327 = vmatmul.msk.f32.gmra.mxu0 %vm32_vm0, %v18_v16 }
  0x2d   :  { %328 = vmatmul.msk.f32.gmra.mxu0 %vm32_vm0, %v19_v17 }
  0x82   :  { %v98_v18 = vpop.f32.mrf.mxu0 }
  0x84   :  { %v116_v19 = vpop.f32.mrf.mxu1 }
  0x88   :  { %v134_v20 = vpop.f32.mrf.mxu3 }
  0x8a   :  { %v101_v21 = vpop.f32.mrf.mxu0  ;;  %v125_v26 = vpop.f32.mrf.mxu2 }
  0x8b   :  { %164 = vmatpush.msrb.mxu1 %v101_v21 }
  0x8c   :  { %v119_v22 = vpop.f32.mrf.mxu1 }
  0x8d   :  { %165 = vmatpush.msrb.mxu1 %v98_v18 }
  0x8e   :  { %339 = vmatmul.msk.f32.vlgmr.msrb.gmra.mxu1 %vm32_vm0, %v146_v23 }
  0x8f   :  { %224 = vmatpush.msra.mxu1 %v119_v22 }
  0x90   :  { %v137_v24 = vpop.f32.mrf.mxu3 }
  0x91   :  { %225 = vmatpush.msra.mxu1 %v116_v19 }
  0x92   :  { %v104_v25 = vpop.f32.mrf.mxu0  ;;  %v128_v31 = vpop.f32.mrf.mxu2 }
  0x93   :  { %284 = vmatpush.msrb.mxu1 %v137_v24 }
  0x94   :  { %v122_v29 = vpop.f32.mrf.mxu1 }
  0x95   :  { %285 = vmatpush.msrb.mxu1 %v134_v20 }
  0x96   :  { %342 = vmatmul.msk.f32.vlgmr.msra.gmra.mxu1 %vm32_vm0, %v146_v23 }
  0x98   :  { %v140_v27 = vpop.f32.mrf.mxu3 }
  0x9a   :  { %v107_v28 = vpop.f32.mrf.mxu0  ;;  %v131_v34 = vpop.f32.mrf.mxu2 }
  0x9b   :  { %184 = vmatpush.msrb.mxu2 %v107_v28 }
  0x9d   :  { %185 = vmatpush.msrb.mxu2 %v104_v25 }
  0x9e   :  { %340 = vmatmul.msk.f32.vlgmr.msrb.gmra.mxu2 %vm32_vm0, %v146_v23  ;;  %345 = vmatmul.msk.f32.vlgmr.msrb.gmra.mxu1 %vm32_vm0, %v146_v23 }
  0x9f   :  { %244 = vmatpush.msra.mxu2 %v125_v26 }
  0xa0   :  { %v143_v30 = vpop.f32.mrf.mxu3 }
  0xa1   :  { %245 = vmatpush.msra.mxu2 %v122_v29 }
  0xa2   :  { %v110_v32 = vpop.f32.mrf.mxu0 }
  0xa3   :  { %304 = vmatpush.msrb.mxu2 %v143_v30 }
  0xa5   :  { %305 = vmatpush.msrb.mxu2 %v140_v27 }
  0xa6   :  { %343 = vmatmul.msk.f32.vlgmr.msra.gmra.mxu2 %vm32_vm0, %v146_v23 }
  0xaa   :  { %v113_v33 = vpop.f32.mrf.mxu0 }
  0xab   :  { %204 = vmatpush.msrb.mxu3 %v113_v33 }
  0xad   :  { %205 = vmatpush.msrb.mxu3 %v110_v32 }
  0xae   :  { %341 = vmatmul.msk.f32.vlgmr.msrb.gmra.mxu3 %vm32_vm0, %v146_v23  ;;  %346 = vmatmul.msk.f32.vlgmr.msrb.gmra.mxu2 %vm32_vm0, %v146_v23 }
  0xaf   :  { %264 = vmatpush.msra.mxu3 %v131_v34 }
  0xb1   :  { %265 = vmatpush.msra.mxu3 %v128_v31 }
  0xb6   :  { %344 = vmatmul.msk.f32.vlgmr.msra.gmra.mxu3 %vm32_vm0, %v146_v23 }
 0x10b   :  { %v167_v35 = vpop.f32.mrf.mxu1 }
 0x10c   :  { %311 = vst.msk [vmem:[%s489_s3] sm:$0xf] %vm310_vm1, %v167_v35 }
 0x113   :  { %v227_v36 = vpop.f32.mrf.mxu1 }
 0x114   :  { %314 = vst.msk [vmem:[%s489_s3 + $0xc] sm:$0xf] %vm310_vm1, %v227_v36 }
 0x11b   :  { %v287_v37 = vpop.f32.mrf.mxu1 }
 0x11c   :  { %317 = vst.msk [vmem:[%s489_s3 + $0x18] sm:$0xf] %vm310_vm1, %v287_v37 }
 0x121   :  { %v187_v38 = vpop.f32.mrf.mxu2 }
 0x122   :  { %312 = vst.msk [vmem:[%s489_s3 + $0x4] sm:$0xf] %vm310_vm1, %v187_v38 }
 0x129   :  { %v247_v39 = vpop.f32.mrf.mxu2 }
 0x12a   :  { %315 = vst.msk [vmem:[%s489_s3 + $0x10] sm:$0xf] %vm310_vm1, %v247_v39 }
 0x131   :  { %v207_v40 = vpop.f32.mrf.mxu3  ;;  %v307_v41 = vpop.f32.mrf.mxu2 }
 0x132   :  { %313 = vst.msk [vmem:[%s489_s3 + $0x8] sm:$0xf] %vm310_vm1, %v207_v40 }
 0x133   :  { %318 = vst.msk [vmem:[%s489_s3 + $0x1c] sm:$0xf] %vm310_vm1, %v307_v41 }
 0x139   :  { %v267_v42 = vpop.f32.mrf.mxu3 }
 0x13a   :  { %316 = vst.msk [vmem:[%s489_s3 + $0x14] sm:$0xf] %vm310_vm1, %v267_v42 }

</bundles_post_ra>
